<compile_context>
chip_gen: v7x
topology: tpu7x:2x2x1
jax: 0.10.0
libtpu: 0.0.40
codegen_flags: <defaults>
</compile_context>

<pallas_src>
import functools

import jax
import jax.numpy as jnp
import numpy as np
from jax.experimental import pallas as pl
from jax.experimental.pallas import tpu as pltpu


# ----------------------------- helpers ---------------------------------------
def _round_up(x, m):
    return ((x + m - 1) // m) * m


def _largest_divisor_tile(dim, max_tile, quantum=128):
    """Largest multiple of `quantum` that divides `dim` and is <= max_tile.

    Assumes dim % quantum == 0 (quantum is always a valid fallback)."""
    best = quantum
    t = quantum
    while t <= min(dim, max_tile):
        if dim % t == 0:
            best = t
        t += quantum
    return best


# ----------------------------- Pallas kernel ---------------------------------
def _gemm_bias_lrelu_kernel(p_ref, w_ref, b_ref, o_ref, acc_ref, *, negative_slope):
    # p_ref:   (tm, tk)   patches tile            (compute dtype, e.g. bf16)
    # w_ref:   (tk, tn)   BN-scale-folded weights (compute dtype)
    # b_ref:   (1,  tn)   folded BN bias          (f32)
    # o_ref:   (tm, tn)   output tile             (f32)
    # acc_ref: (tm, tn)   f32 accumulator scratch
    kk = pl.program_id(2)

    @pl.when(kk == 0)
    def _():
        acc_ref[...] = jnp.zeros_like(acc_ref)

    acc_ref[...] += jnp.dot(p_ref[...], w_ref[...],
                            preferred_element_type=jnp.float32)

    @pl.when(kk == pl.num_programs(2) - 1)
    def _():
        y = acc_ref[...] + b_ref[...]
        o_ref[...] = jnp.where(y > 0, y, negative_slope * y).astype(o_ref.dtype)


def _fused_conv_gemm(patches, w2d, bias2d, *, negative_slope=0.1,
                     tm_max=512, tk_max=1024, tn_max=256):
    """out(M, Cout_pad) = leaky_relu(patches @ w2d + bias), tiled over (M, Cout, K)."""
    M, K = patches.shape
    Kw, cout_pad = w2d.shape
    assert K == Kw and cout_pad % 128 == 0
    cd = patches.dtype
    itemsize = jnp.dtype(cd).itemsize

    # ---- tile selection ------------------------------------------------------
    tm = min(tm_max, _round_up(M, 8))          # ragged last M tile: Pallas masks it
    if K > tk_max:
        # Tile the contraction dim; pad K to a lane multiple so K-tiles are exact.
        k_pad = _round_up(K, 128)
        if k_pad != K:
            patches = jnp.pad(patches, ((0, 0), (0, k_pad - K)))
            w2d = jnp.pad(w2d, ((0, k_pad - K), (0, 0)))
            K = k_pad
        tk = _largest_divisor_tile(K, tk_max, 128)
    else:
        tk = K                                  # full contraction dim VMEM-resident
    tn = _largest_divisor_tile(cout_pad, tn_max, 128)

    grid = (pl.cdiv(M, tm), cout_pad // tn, K // tk)

    # Rough per-step VMEM: double-buffered inputs/outputs + f32 accumulator.
    vmem_est = (2 * tm * tk * itemsize + 2 * tk * tn * itemsize + 2 * tn * 4
                + 2 * tm * tn * 4 + tm * tn * 4)
    vmem_limit = int(min(max(2 * vmem_est, 16 * 1024 * 1024), 60 * 1024 * 1024))

    kernel = functools.partial(_gemm_bias_lrelu_kernel,
                               negative_slope=negative_slope)
    out = pl.pallas_call(
        kernel,
        out_shape=jax.ShapeDtypeStruct((M, cout_pad), jnp.float32),
        grid_spec=pltpu.PrefetchScalarGridSpec(
            num_scalar_prefetch=0,
            grid=grid,
            in_specs=[
                pl.BlockSpec((tm, tk), lambda i, j, kk: (i, kk)),
                pl.BlockSpec((tk, tn), lambda i, j, kk: (kk, j)),
                pl.BlockSpec((1, tn), lambda i, j, kk: (0, j)),
            ],
            out_specs=pl.BlockSpec((tm, tn), lambda i, j, kk: (i, j)),
            scratch_shapes=[pltpu.VMEM((tm, tn), jnp.float32)],
        ),
        compiler_params=pltpu.CompilerParams(
            dimension_semantics=("parallel", "parallel", "arbitrary"),
            vmem_limit_bytes=vmem_limit,
        ),
        cost_estimate=pl.CostEstimate(
            flops=2 * M * K * cout_pad,
            transcendentals=0,
            bytes_accessed=int(patches.size * itemsize + w2d.size * itemsize
                               + bias2d.size * 4 + M * cout_pad * 4),
        ),
    )(patches, w2d, bias2d)
    return out


# ------------------------------ glue (im2col) ---------------------------------
def _im2col(x, k, p, s, d, out_dtype):
    # x: (N, C, H, W) -> patches (N*OH*OW, C*k*k)   [K ordered (C, kh, kw)]
    N, C, H, W = x.shape
    if p:
        x = jnp.pad(x, ((0, 0), (0, 0), (p, p), (p, p)))
    Hp, Wp = H + 2 * p, W + 2 * p
    OH = (Hp - d * (k - 1) - 1) // s + 1
    OW = (Wp - d * (k - 1) - 1) // s + 1

    if k == 1:
        # Pointwise conv: no gather needed, just a strided subsample + NHWC reshape.
        xs = x[:, :, :(OH - 1) * s + 1:s, :(OW - 1) * s + 1:s]
        patches = jnp.transpose(xs, (0, 2, 3, 1)).reshape(N * OH * OW, C)
        return patches.astype(out_dtype), OH, OW

    row_idx = (jnp.arange(OH) * s)[:, None] + (jnp.arange(k) * d)[None, :]  # (OH, k)
    col_idx = (jnp.arange(OW) * s)[:, None] + (jnp.arange(k) * d)[None, :]  # (OW, k)
    # (N, C, OH, k, OW, k) -> (N, OH, OW, C, k, k) -> (M, K)
    patches = x[:, :, row_idx[:, :, None, None], col_idx[None, None, :, :]]
    patches = jnp.transpose(patches, (0, 2, 4, 1, 3, 5))
    patches = patches.reshape(N * OH * OW, C * k * k)
    return patches.astype(out_dtype), OH, OW


# ------------------------------ module wrapper ---------------------------------
class ConvPallas:
    """Mirrors network.py::Conv (Conv2d(bias=False) + BatchNorm2d(eval) + LeakyReLU(0.1))."""

    def __init__(self, in_ch, out_ch, k=1, p=0, s=1, d=1, act=True, *,
                 key=None, compute_dtype=jnp.bfloat16):
        self.in_ch, self.out_ch = in_ch, out_ch
        self.k, self.p, self.s, self.d = k, p, s, d
        self.act = act
        self.compute_dtype = compute_dtype
        if key is None:
            key = jax.random.PRNGKey(0)
        kw, kg, kb, km, kv = jax.random.split(key, 5)
        fan_in = in_ch * k * k
        bound = 1.0 / np.sqrt(fan_in)
        self.weight = jax.random.uniform(
            kw, (out_ch, in_ch, k, k), jnp.float32, -bound, bound)
        # BatchNorm2d params / running stats (eval mode), deterministic.
        self.gamma = jax.random.uniform(kg, (out_ch,), jnp.float32, 0.5, 1.5)
        self.beta = jax.random.uniform(kb, (out_ch,), jnp.float32, -0.5, 0.5)
        self.running_mean = jax.random.uniform(km, (out_ch,), jnp.float32, -0.5, 0.5)
        self.running_var = jax.random.uniform(kv, (out_ch,), jnp.float32, 0.5, 1.5)
        self.eps = 1e-5

    def __call__(self, x):
        # x: (N, C_in, H, W) f32  ->  (N, C_out, OH, OW) f32
        N = x.shape[0]
        cd = self.compute_dtype
        K = self.in_ch * self.k * self.k
        cout = self.out_ch
        cout_pad = _round_up(cout, 128)

        patches, OH, OW = _im2col(x, self.k, self.p, self.s, self.d, out_dtype=cd)

        # Fold BN (eval mode) into the GEMM: scale into weights, bias in epilogue.
        scale = self.gamma / jnp.sqrt(self.running_var + self.eps)       # (Cout,)
        bias = self.beta - self.running_mean * scale                     # (Cout,)
        w2d = self.weight.reshape(cout, K).T * scale[None, :]            # (K, Cout) f32
        if cout_pad != cout:
            w2d = jnp.pad(w2d, ((0, 0), (0, cout_pad - cout)))
            bias = jnp.pad(bias, (0, cout_pad - cout))
        w2d = w2d.astype(cd)
        bias2d = bias.reshape(1, cout_pad).astype(jnp.float32)

        slope = 0.1 if self.act else 1.0        # Identity == LeakyReLU(slope=1)
        y = _fused_conv_gemm(patches, w2d, bias2d, negative_slope=slope)

        y = y.reshape(N, OH, OW, cout_pad)[..., :cout]
        return jnp.transpose(y, (0, 3, 1, 2))   # back to NCHW (PyTorch interface)


# ------------------------------ reference check --------------------------------
def _reference(conv: ConvPallas, x):
    y = jax.lax.conv_general_dilated(
        x, conv.weight,
        window_strides=(conv.s, conv.s),
        padding=[(conv.p, conv.p), (conv.p, conv.p)],
        rhs_dilation=(conv.d, conv.d),
        dimension_numbers=("NCHW", "OIHW", "NCHW"),
    )
    scale = (conv.gamma / jnp.sqrt(conv.running_var + conv.eps)).reshape(1, -1, 1, 1)
    bias = conv.beta.reshape(1, -1, 1, 1) - conv.running_mean.reshape(1, -1, 1, 1) * scale
    y = y * scale + bias
    if conv.act:
        y = jnp.where(y > 0, y, 0.1 * y)
    return y


if __name__ == "__main__":
    key = jax.random.PRNGKey(0)
    kx, kp = jax.random.split(key)

    # Small shapes: batch=2, in_ch=4, out_ch=8, spatial=16, 3x3 conv, pad=1.
    x = jax.random.normal(kx, (2, 4, 16, 16), jnp.float32)

    # f32-operand path: tight check against the XLA reference.
    conv_f32 = ConvPallas(4, 8, k=3, p=1, s=1, d=1, act=True, key=kp,
                          compute_dtype=jnp.float32)
    out_f32 = jax.block_until_ready(conv_f32(x))
    ref = _reference(conv_f32, x)
    np.testing.assert_allclose(np.asarray(out_f32), np.asarray(ref),
                               rtol=1e-4, atol=1e-4)

    # Default bf16-operand path (MXU-native on v6e/v7x), f32 accumulation.
    conv_bf16 = ConvPallas(4, 8, k=3, p=1, s=1, d=1, act=True, key=kp)
    out_bf16 = jax.block_until_ready(conv_bf16(x))
    np.testing.assert_allclose(np.asarray(out_bf16), np.asarray(ref),
                               rtol=5e-2, atol=5e-2)

    # 1x1 pointwise fast path (no im2col gather) with act=False (Identity).
    conv_1x1 = ConvPallas(4, 8, k=1, p=0, s=1, d=1, act=False, key=kp,
                          compute_dtype=jnp.float32)
    out_1x1 = jax.block_until_ready(conv_1x1(x))
    ref_1x1 = _reference(conv_1x1, x)
    np.testing.assert_allclose(np.asarray(out_1x1), np.asarray(ref_1x1),
                               rtol=1e-4, atol=1e-4)

    print("KERNEL_OK")
</pallas_src>

<mosaic_0001>
module attributes {stable_mosaic.version = 11 : i64} {
  func.func @_gemm_bias_lrelu_kernel(%arg0: i32, %arg1: i32, %arg2: i32, %arg3: memref<512x36xf32, #tpu.memory_space<vmem>>, %arg4: memref<36x128xf32, #tpu.memory_space<vmem>>, %arg5: memref<1x128xf32, #tpu.memory_space<vmem>>, %arg6: memref<512x128xf32, #tpu.memory_space<vmem>>, %arg7: memref<512x128xf32, #tpu.memory_space<vmem>>) attributes {dimension_semantics = [#tpu.dimension_semantics<parallel>, #tpu.dimension_semantics<parallel>, #tpu.dimension_semantics<arbitrary>], iteration_bounds = array<i64: 1, 1, 1>, scalar_prefetch = 0 : i64, scratch_operands = 1 : i64, tpu.core_type = #tpu.core_type<tc>, window_params = [{transform_indices = @transform_0, window_bounds = array<i64: 512, 36>}, {transform_indices = @transform_1, window_bounds = array<i64: 36, 128>}, {transform_indices = @transform_2, window_bounds = array<i64: 1, 128>}, {transform_indices = @transform_3, window_bounds = array<i64: 512, 128>}]} {
    %c0_i32 = arith.constant 0 : i32
    %0 = arith.cmpi eq, %arg2, %c0_i32 : i32
    %1 = arith.extui %0 : i1 to i32
    %c0_i32_0 = arith.constant 0 : i32
    %2 = arith.cmpi ne, %1, %c0_i32_0 : i32
    scf.if %2 {
      %cst_10 = arith.constant 0.000000e+00 : f32
      %12 = vector.broadcast %cst_10 : f32 to vector<512x128xf32>
      %c0_11 = arith.constant 0 : index
      %c0_12 = arith.constant 0 : index
      %13 = vector.load %arg7[%c0_11, %c0_12] : memref<512x128xf32, #tpu.memory_space<vmem>>, vector<512x128xf32>
      tpu.vector_store %arg7[%c0_11, %c0_12], %12 {strides = array<i32>} : memref<512x128xf32, #tpu.memory_space<vmem>>, vector<512x128xf32>,
    } else {
    }
    %c0 = arith.constant 0 : index
    %c0_1 = arith.constant 0 : index
    %3 = vector.load %arg7[%c0, %c0_1] : memref<512x128xf32, #tpu.memory_space<vmem>>, vector<512x128xf32>
    %c0_2 = arith.constant 0 : index
    %c0_3 = arith.constant 0 : index
    %4 = vector.load %arg3[%c0_2, %c0_3] : memref<512x36xf32, #tpu.memory_space<vmem>>, vector<512x36xf32>
    %c0_4 = arith.constant 0 : index
    %c0_5 = arith.constant 0 : index
    %5 = vector.load %arg4[%c0_4, %c0_5] : memref<36x128xf32, #tpu.memory_space<vmem>>, vector<36x128xf32>
    %cst = arith.constant dense<0.000000e+00> : vector<512x128xf32>
    %6 = tpu.matmul %4, %5, %cst {dimension_numbers = #tpu.dot_dimension_numbers<[1], [0], [0], [1], [0, 0, 1, 1], [], []>} : vector<512x36xf32>, vector<36x128xf32>, vector<512x128xf32> -> vector<512x128xf32>
    %7 = arith.addf %3, %6 : vector<512x128xf32>
    %c0_6 = arith.constant 0 : index
    %c0_7 = arith.constant 0 : index
    %8 = vector.load %arg7[%c0_6, %c0_7] : memref<512x128xf32, #tpu.memory_space<vmem>>, vector<512x128xf32>
    tpu.vector_store %arg7[%c0_6, %c0_7], %7 {strides = array<i32>} : memref<512x128xf32, #tpu.memory_space<vmem>>, vector<512x128xf32>,
    %c0_i32_8 = arith.constant 0 : i32
    %9 = arith.cmpi eq, %arg2, %c0_i32_8 : i32
    %10 = arith.extui %9 : i1 to i32
    %c0_i32_9 = arith.constant 0 : i32
    %11 = arith.cmpi ne, %10, %c0_i32_9 : i32
    scf.if %11 {
      %c0_10 = arith.constant 0 : index
      %c0_11 = arith.constant 0 : index
      %12 = vector.load %arg7[%c0_10, %c0_11] : memref<512x128xf32, #tpu.memory_space<vmem>>, vector<512x128xf32>
      %c0_12 = arith.constant 0 : index
      %c0_13 = arith.constant 0 : index
      %13 = vector.load %arg5[%c0_12, %c0_13] : memref<1x128xf32, #tpu.memory_space<vmem>>, vector<1x128xf32>
      %14 = vector.broadcast %13 : vector<1x128xf32> to vector<512x128xf32>
      %15 = arith.addf %12, %14 : vector<512x128xf32>
      %cst_14 = arith.constant 0.000000e+00 : f32
      %16 = vector.broadcast %cst_14 : f32 to vector<512x128xf32>
      %17 = arith.cmpf ogt, %15, %16 : vector<512x128xf32>
      %cst_15 = arith.constant 1.000000e-01 : f32
      %18 = vector.broadcast %cst_15 : f32 to vector<512x128xf32>
      %19 = arith.mulf %18, %15 : vector<512x128xf32>
      %20 = arith.select %17, %15, %19 : vector<512x128xi1>, vector<512x128xf32>
      %c0_16 = arith.constant 0 : index
      %c0_17 = arith.constant 0 : index
      %21 = vector.load %arg6[%c0_16, %c0_17] : memref<512x128xf32, #tpu.memory_space<vmem>>, vector<512x128xf32>
      tpu.vector_store %arg6[%c0_16, %c0_17], %20 {strides = array<i32>} : memref<512x128xf32, #tpu.memory_space<vmem>>, vector<512x128xf32>,
    } else {
    }
    return
  }
  func.func @transform_0(%arg0: i32, %arg1: i32, %arg2: i32) -> (i32, i32) {
    %c0_i32 = arith.constant 0 : i32
    return %arg0, %arg2 : i32, i32
  }
  func.func @transform_1(%arg0: i32, %arg1: i32, %arg2: i32) -> (i32, i32) {
    %c0_i32 = arith.constant 0 : i32
    return %arg2, %arg1 : i32, i32
  }
  func.func @transform_2(%arg0: i32, %arg1: i32, %arg2: i32) -> (i32, i32) {
    %c0_i32 = arith.constant 0 : i32
    %c0_i32_0 = arith.constant 0 : i32
    return %c0_i32, %arg1 : i32, i32
  }
  func.func @transform_3(%arg0: i32, %arg1: i32, %arg2: i32) -> (i32, i32) {
    %c0_i32 = arith.constant 0 : i32
    return %arg0, %arg1 : i32, i32
  }
}

</mosaic_0001>

<bundles_post_ra>
// kernel: tpu_custom_call.1
= control target key start
LH: loop header
LB: loop body
LE: loop exit
PB: predicated region body
PF: predicated region fallthrough
CT: control target
= control target key end

     0   :  { %vm216_vm0 = vcmask 293888   ;;  %vm409_vm1 = vcmask 1043456   ;;  %s1993_s0 = inlined_call_operand.vmem [shape: f32[512,36], index: 0, kind: input, shape index: {}]   ;;  %s1994_s1 = inlined_call_operand.vmem [shape: f32[36,128], index: 1, kind: input, shape index: {}]   ;;  %s1995_s2 = inlined_call_operand.vmem [shape: f32[1,128], index: 2, kind: input, shape index: {}]   ;;  %s1996_s3 = inlined_call_operand.hbm [shape: f32[512,128], index: 3, kind: output, shape index: {}]  }
   0x1   :  { %v211_v0 = vld [vmem:[%s1994_s1] sm:$0xff]  ;;  %v212_v1 = vld [vmem:[%s1994_s1 + $0x8] sm:$0xff]  ;;  %v213_v2 = vld [vmem:[%s1994_s1 + $0x10] sm:$0xff] }
   0x2   :  { %v1577_v3 = vpack.c.bf16 %v212_v1, %v211_v0  ;;  %v214_v4 = vld [vmem:[%s1994_s1 + $0x18] sm:$0xff]  ;;  %v147_v5 = vld [vmem:[%s1993_s0] sm:$0xff]  ;;  %v148_v9 = vld [vmem:[%s1993_s0 + $0x8] sm:$0xff] }
   0x3   :  { %v1581_v6 = vpack.c.bf16 %v214_v4, %v213_v2  ;;  %1481 = vmatprep.mubr.msk.f32.mxu0 %vm216_vm0, %v147_v5  ;;  %v179_v7 = vld [vmem:[%s1993_s0 + $0x100] sm:$0xff]  ;;  %v180_v10 = vld [vmem:[%s1993_s0 + $0x108] sm:$0xff]  ;;  %v149_v11 = vld [vmem:[%s1993_s0 + $0x10] sm:$0xff] }
   0x4   :  { %1578 = vmatprep.subr.bf16.mxu0 %v1577_v3  ;;  %1585 = vmatprep.subr.bf16.mxu1 %v1577_v3  ;;  %v215_v8 = vld [vmem:[%s1994_s1 + $0x20] sm:$0xf]  ;;  %v181_v12 = vld [vmem:[%s1993_s0 + $0x110] sm:$0xff]  ;;  %v150_v13 = vld [vmem:[%s1993_s0 + $0x18] sm:$0xff] }
   0x5   :  { %1580 = vmatpush3.bf16.msra.mxu0 %v1577_v3  ;;  %1588 = vmatpush3.bf16.msra.mxu1 %v1577_v3  ;;  %v182_v14 = vld [vmem:[%s1993_s0 + $0x118] sm:$0xff]  ;;  %v151_v15 = vld [vmem:[%s1993_s0 + $0x20] sm:$0xff]  ;;  %v152_v17 = vld [vmem:[%s1993_s0 + $0x28] sm:$0xff] }
   0x6   :  { %1582 = vmatprep.subr.bf16.mxu0 %v1581_v6  ;;  %1586 = vmatprep.subr.bf16.mxu1 %v1581_v6  ;;  %v183_v16 = vld [vmem:[%s1993_s0 + $0x120] sm:$0xff]  ;;  %v184_v18 = vld [vmem:[%s1993_s0 + $0x128] sm:$0xff]  ;;  %v153_v19 = vld [vmem:[%s1993_s0 + $0x30] sm:$0xff] }
   0x7   :  { %1529 = vmatprep.mubr.msk.f32.mxu1 %vm216_vm0, %v179_v7  ;;  %v185_v20 = vld [vmem:[%s1993_s0 + $0x130] sm:$0xff]  ;;  %v154_v21 = vld [vmem:[%s1993_s0 + $0x38] sm:$0xff]  ;;  %v155_v23 = vld [vmem:[%s1993_s0 + $0x40] sm:$0xff] }
   0x8   :  { %v186_v22 = vld [vmem:[%s1993_s0 + $0x138] sm:$0xff]  ;;  %v187_v24 = vld [vmem:[%s1993_s0 + $0x140] sm:$0xff] }
   0x9   :  { %1584 = vmatpush3.bf16.msra.mxu0 %v1581_v6  ;;  %1589 = vmatpush3.bf16.msra.mxu1 %v1581_v6 }
   0xa   :  { %1479 = vmatprep.subr.msk.mxu0 %vm409_vm1, %v215_v8  ;;  %1587 = vmatprep.subr.msk.mxu1 %vm409_vm1, %v215_v8 }
   0xd   :  { %1480 = vmatpush3.msk.msra.mxu0 %vm409_vm1, %v215_v8  ;;  %1590 = vmatpush3.msk.msra.mxu1 %vm409_vm1, %v215_v8 }
   0xe   :  { %1482 = vmatmul.mubr.msk.f32.vlgmr.msra.gmra.mrb[0].mxu0 %vm216_vm0, %v148_v9  ;;  %1530 = vmatmul.mubr.msk.f32.vlgmr.msra.gmra.mrb[0].mxu1 %vm216_vm0, %v180_v10 }
   0xf   :  { %1484 = vmatprep.mubr.msk.f32.mxu0 %vm216_vm0, %v149_v11  ;;  %1532 = vmatprep.mubr.msk.f32.mxu1 %vm216_vm0, %v181_v12 }
  0x12   :  { %1485 = vmatmul.mubr.msk.f32.gmra.mrb[2].mxu0 %vm216_vm0, %v150_v13  ;;  %1533 = vmatmul.mubr.msk.f32.gmra.mrb[2].mxu1 %vm216_vm0, %v182_v14 }
  0x13   :  { %1487 = vmatprep.mubr.msk.f32.mxu0 %vm216_vm0, %v151_v15  ;;  %1535 = vmatprep.mubr.msk.f32.mxu1 %vm216_vm0, %v183_v16 }
  0x16   :  { %1488 = vmatmul.mubr.msk.f32.gmra.mrb[4].mxu0 %vm216_vm0, %v152_v17  ;;  %1536 = vmatmul.mubr.msk.f32.gmra.mrb[4].mxu1 %vm216_vm0, %v184_v18 }
  0x17   :  { %1490 = vmatprep.mubr.msk.f32.mxu0 %vm216_vm0, %v153_v19  ;;  %1538 = vmatprep.mubr.msk.f32.mxu1 %vm216_vm0, %v185_v20 }
  0x18   :  { %8 = vsyncpa [#allocation4], 0  ;;  %v156_v25 = vld [vmem:[%s1993_s0 + $0x48] sm:$0xff]  ;;  %v157_v27 = vld [vmem:[%s1993_s0 + $0x50] sm:$0xff] }
  0x19   :  { %v188_v26 = vld [vmem:[%s1993_s0 + $0x148] sm:$0xff]  ;;  %v189_v28 = vld [vmem:[%s1993_s0 + $0x150] sm:$0xff]  ;;  %v158_v29 = vld [vmem:[%s1993_s0 + $0x58] sm:$0xff] }
  0x1a   :  { %1491 = vmatmul.mubr.msk.f32.gmra.mrb[6].mxu0 %vm216_vm0, %v154_v21  ;;  %1539 = vmatmul.mubr.msk.f32.gmra.mrb[6].mxu1 %vm216_vm0, %v186_v22  ;;  %v190_v30 = vld [vmem:[%s1993_s0 + $0x158] sm:$0xff]  ;;  %v159_v31 = vld [vmem:[%s1993_s0 + $0x60] sm:$0xff]  ;;  %v160_v33 = vld [vmem:[%s1993_s0 + $0x68] sm:$0xff] }
  0x1b   :  { %1493 = vmatprep.mubr.msk.f32.mxu0 %vm216_vm0, %v155_v23  ;;  %1541 = vmatprep.mubr.msk.f32.mxu1 %vm216_vm0, %v187_v24  ;;  %v191_v32 = vld [vmem:[%s1993_s0 + $0x160] sm:$0xff]  ;;  %v192_v34 = vld [vmem:[%s1993_s0 + $0x168] sm:$0xff]  ;;  %v161_v35 = vld [vmem:[%s1993_s0 + $0x70] sm:$0xff] }
  0x1c   :  { %v193_v36 = vld [vmem:[%s1993_s0 + $0x170] sm:$0xff]  ;;  %v162_v37 = vld [vmem:[%s1993_s0 + $0x78] sm:$0xff]  ;;  %v163_v39 = vld [vmem:[%s1993_s0 + $0x80] sm:$0xff] }
  0x1d   :  { %v194_v38 = vld [vmem:[%s1993_s0 + $0x178] sm:$0xff]  ;;  %v195_v40 = vld [vmem:[%s1993_s0 + $0x180] sm:$0xff]  ;;  %v164_v41 = vld [vmem:[%s1993_s0 + $0x88] sm:$0xff] }
  0x1e   :  { %1494 = vmatmul.mubr.msk.f32.gmra.mrb[8].mxu0 %vm216_vm0, %v156_v25  ;;  %1542 = vmatmul.mubr.msk.f32.gmra.mrb[8].mxu1 %vm216_vm0, %v188_v26  ;;  %v196_v42 = vld [vmem:[%s1993_s0 + $0x188] sm:$0xff]  ;;  %v165_v43 = vld [vmem:[%s1993_s0 + $0x90] sm:$0xff]  ;;  %v166_v45 = vld [vmem:[%s1993_s0 + $0x98] sm:$0xff] }
  0x1f   :  { %1496 = vmatprep.mubr.msk.f32.mxu0 %vm216_vm0, %v157_v27  ;;  %1544 = vmatprep.mubr.msk.f32.mxu1 %vm216_vm0, %v189_v28  ;;  %v197_v44 = vld [vmem:[%s1993_s0 + $0x190] sm:$0xff]  ;;  %v198_v46 = vld [vmem:[%s1993_s0 + $0x198] sm:$0xff]  ;;  %v167_v47 = vld [vmem:[%s1993_s0 + $0xa0] sm:$0xff] }
  0x20   :  { %v199_v48 = vld [vmem:[%s1993_s0 + $0x1a0] sm:$0xff]  ;;  %v168_v49 = vld [vmem:[%s1993_s0 + $0xa8] sm:$0xff]  ;;  %v169_v51 = vld [vmem:[%s1993_s0 + $0xb0] sm:$0xff] }
  0x21   :  { %v200_v50 = vld [vmem:[%s1993_s0 + $0x1a8] sm:$0xff]  ;;  %v201_v52 = vld [vmem:[%s1993_s0 + $0x1b0] sm:$0xff]  ;;  %v170_v53 = vld [vmem:[%s1993_s0 + $0xb8] sm:$0xff] }
  0x22   :  { %1497 = vmatmul.mubr.msk.f32.gmra.mrb[10].mxu0 %vm216_vm0, %v158_v29  ;;  %1545 = vmatmul.mubr.msk.f32.gmra.mrb[10].mxu1 %vm216_vm0, %v190_v30  ;;  %v202_v54 = vld [vmem:[%s1993_s0 + $0x1b8] sm:$0xff]  ;;  %v171_v55 = vld [vmem:[%s1993_s0 + $0xc0] sm:$0xff]  ;;  %v172_v57 = vld [vmem:[%s1993_s0 + $0xc8] sm:$0xff] }
  0x23   :  { %1499 = vmatprep.mubr.msk.f32.mxu0 %vm216_vm0, %v159_v31  ;;  %1547 = vmatprep.mubr.msk.f32.mxu1 %vm216_vm0, %v191_v32  ;;  %v203_v56 = vld [vmem:[%s1993_s0 + $0x1c0] sm:$0xff]  ;;  %v204_v58 = vld [vmem:[%s1993_s0 + $0x1c8] sm:$0xff]  ;;  %v173_v59 = vld [vmem:[%s1993_s0 + $0xd0] sm:$0xff] }
  0x24   :  { %v205_v60 = vld [vmem:[%s1993_s0 + $0x1d0] sm:$0xff]  ;;  %v174_v61 = vld [vmem:[%s1993_s0 + $0xd8] sm:$0xff]  ;;  %v175_v63 = vld [vmem:[%s1993_s0 + $0xe0] sm:$0xff] }
  0x25   :  { %v206_v62 = vld [vmem:[%s1993_s0 + $0x1d8] sm:$0xff]  ;;  %v207_v0 = vld [vmem:[%s1993_s0 + $0x1e0] sm:$0xff]  ;;  %v176_v1 = vld [vmem:[%s1993_s0 + $0xe8] sm:$0xff] }
  0x26   :  { %1500 = vmatmul.mubr.msk.f32.gmra.mrb[12].mxu0 %vm216_vm0, %v160_v33  ;;  %1548 = vmatmul.mubr.msk.f32.gmra.mrb[12].mxu1 %vm216_vm0, %v192_v34  ;;  %v208_v2 = vld [vmem:[%s1993_s0 + $0x1e8] sm:$0xff]  ;;  %v177_v3 = vld [vmem:[%s1993_s0 + $0xf0] sm:$0xff]  ;;  %v178_v5 = vld [vmem:[%s1993_s0 + $0xf8] sm:$0xff] }
  0x27   :  { %1502 = vmatprep.mubr.msk.f32.mxu0 %vm216_vm0, %v161_v35  ;;  %1550 = vmatprep.mubr.msk.f32.mxu1 %vm216_vm0, %v193_v36  ;;  %v209_v4 = vld [vmem:[%s1993_s0 + $0x1f0] sm:$0xff]  ;;  %v210_v6 = vld [vmem:[%s1993_s0 + $0x1f8] sm:$0xff]  ;;  %v1915_v7 = vld [vmem:[%s1995_s2] ss:$0 sm:$0xff]  ;;  %s1618_s0 = smov [#allocation3]  }
  0x28   :  { %s1325_s2 = sshll.u32 %s1618_s0, 4  ;;  %s1326_s2 = int_to_ptr.vmem [resolvable:$true] %s1325_s2 }
  0x29   :  { %s1594_s12 = scalar_lea.vmem %s1326_s2, 8192  ;;  %p1599_p1 = scmp.lt.s32.totalorder %s1326_s2, %s1326_s2 }
  0x2a   :  { %1503 = vmatmul.mubr.msk.f32.gmra.mrb[14].mxu0 %vm216_vm0, %v162_v37  ;;  %1551 = vmatmul.mubr.msk.f32.gmra.mrb[14].mxu1 %vm216_vm0, %v194_v38  ;;  %p1595_p0 = scmp.ne.s32.totalorder %s1326_s2, %s1594_s12  ;;  %p1600_p2 = scmp.lt.s32.totalorder %s1594_s12, %s1594_s12 }
  0x2b   :  { %1505 = vmatprep.mubr.msk.f32.mxu0 %vm216_vm0, %v163_v39  ;;  %1553 = vmatprep.mubr.msk.f32.mxu1 %vm216_vm0, %v195_v40 }
  0x2c   :  { %p1601_p3 = por %p1600_p2, %p1599_p1 }
  0x2e   :  { %1506 = vmatmul.mubr.msk.f32.gmra.mrb[16].mxu0 %vm216_vm0, %v164_v41  ;;  %1554 = vmatmul.mubr.msk.f32.gmra.mrb[16].mxu1 %vm216_vm0, %v196_v42  ;;  %p1602_p4 = pnand %p1601_p3, %p1595_p0 }
  0x2f   :  { %1508 = vmatprep.mubr.msk.f32.mxu0 %vm216_vm0, %v165_v43  ;;  %1556 = vmatprep.mubr.msk.f32.mxu1 %vm216_vm0, %v197_v44 }
  0x32   :  { %1509 = vmatmul.mubr.msk.f32.gmra.mrb[18].mxu0 %vm216_vm0, %v166_v45  ;;  %1557 = vmatmul.mubr.msk.f32.gmra.mrb[18].mxu1 %vm216_vm0, %v198_v46 }
  0x33   :  { %1511 = vmatprep.mubr.msk.f32.mxu0 %vm216_vm0, %v167_v47  ;;  %1559 = vmatprep.mubr.msk.f32.mxu1 %vm216_vm0, %v199_v48 }
  0x36   :  { %1512 = vmatmul.mubr.msk.f32.gmra.mrb[20].mxu0 %vm216_vm0, %v168_v49  ;;  %1560 = vmatmul.mubr.msk.f32.gmra.mrb[20].mxu1 %vm216_vm0, %v200_v50 }
  0x37   :  { %1514 = vmatprep.mubr.msk.f32.mxu0 %vm216_vm0, %v169_v51  ;;  %1562 = vmatprep.mubr.msk.f32.mxu1 %vm216_vm0, %v201_v52 }
  0x3a   :  { %1515 = vmatmul.mubr.msk.f32.gmra.mrb[22].mxu0 %vm216_vm0, %v170_v53  ;;  %1563 = vmatmul.mubr.msk.f32.gmra.mrb[22].mxu1 %vm216_vm0, %v202_v54 }
  0x3b   :  { %1517 = vmatprep.mubr.msk.f32.mxu0 %vm216_vm0, %v171_v55  ;;  %1565 = vmatprep.mubr.msk.f32.mxu1 %vm216_vm0, %v203_v56 }
  0x3e   :  { %1518 = vmatmul.mubr.msk.f32.gmra.mrb[24].mxu0 %vm216_vm0, %v172_v57  ;;  %1566 = vmatmul.mubr.msk.f32.gmra.mrb[24].mxu1 %vm216_vm0, %v204_v58 }
  0x3f   :  { %1520 = vmatprep.mubr.msk.f32.mxu0 %vm216_vm0, %v173_v59  ;;  %1568 = vmatprep.mubr.msk.f32.mxu1 %vm216_vm0, %v205_v60 }
  0x42   :  { %1521 = vmatmul.mubr.msk.f32.gmra.mrb[26].mxu0 %vm216_vm0, %v174_v61  ;;  %1569 = vmatmul.mubr.msk.f32.gmra.mrb[26].mxu1 %vm216_vm0, %v206_v62 }
  0x43   :  { %1523 = vmatprep.mubr.msk.f32.mxu0 %vm216_vm0, %v175_v63  ;;  %1571 = vmatprep.mubr.msk.f32.mxu1 %vm216_vm0, %v207_v0 }
  0x46   :  { %1524 = vmatmul.mubr.msk.f32.gmra.mrb[28].mxu0 %vm216_vm0, %v176_v1  ;;  %1572 = vmatmul.mubr.msk.f32.gmra.mrb[28].mxu1 %vm216_vm0, %v208_v2 }
  0x47   :  { %1526 = vmatprep.mubr.msk.f32.mxu0 %vm216_vm0, %v177_v3  ;;  %1574 = vmatprep.mubr.msk.f32.mxu1 %vm216_vm0, %v209_v4 }
  0x4a   :  { %1527 = vmatmul.mubr.msk.f32.gmra.mrb[30].mxu0 %vm216_vm0, %v178_v5  ;;  %1575 = vmatmul.mubr.msk.f32.gmra.mrb[30].mxu1 %vm216_vm0, %v210_v6 }
  0xe1   :  { %v1483_v8 = vpop.f32.mrb[0].mxu0  ;;  %v1531_v9 = vpop.f32.mrb[0].mxu1 }
  0xe2   :  { %v1001_v10 = vadd.f32 %v1483_v8, %v1915_v7  ;;  %v1033_v11 = vadd.f32 %v1531_v9, %v1915_v7  ;;  %v479_v12 = vpop.f32.mrb[1].mxu0  ;;  %v639_v13 = vpop.f32.mrb[1].mxu1 }
  0xe3   :  { %v1000_v14 = vadd.f32 %v1915_v7, %v479_v12  ;;  %v1032_v15 = vadd.f32 %v1915_v7, %v639_v13 }
  0xe4   :  { %vm1065_vm2 = vcmp.gt.f32.partialorder %v1001_v10, 0.0  ;;  %v1129_v16 = vmul.f32 0.1, %v1001_v10  ;;  %vm1097_vm3 = vcmp.gt.f32.partialorder %v1033_v11, 0.0  ;;  %v1161_v17 = vmul.f32 0.1, %v1033_v11 }
  0xe5   :  { %vm1064_vm4 = vcmp.gt.f32.partialorder %v1000_v14, 0.0  ;;  %v1128_v18 = vmul.f32 0.1, %v1000_v14  ;;  %vm1096_vm5 = vcmp.gt.f32.partialorder %v1032_v15, 0.0  ;;  %v1160_v19 = vmul.f32 0.1, %v1032_v15 }
  0xe6   :  { %v1193_v20 = vsel %vm1065_vm2, %v1001_v10, %v1129_v16  ;;  %v1225_v21 = vsel %vm1097_vm3, %v1033_v11, %v1161_v17  ;;  %v1486_v22 = vpop.f32.mrb[2].mxu0  ;;  %v1534_v23 = vpop.f32.mrb[2].mxu1 }
  0xe7   :  { %1257 = vst [vmem:[#allocation3 + $0x8] sm:$0xff] %v1193_v20  ;;  %1289 = vst [vmem:[#allocation3 + $0x108] sm:$0xff] %v1225_v21  ;;  %v1192_v24 = vsel %vm1064_vm4, %v1000_v14, %v1128_v18  ;;  %v1224_v25 = vsel %vm1096_vm5, %v1032_v15, %v1160_v19  ;;  %v1003_v26 = vadd.f32 %v1486_v22, %v1915_v7  ;;  %v489_v28 = vpop.f32.mrb[3].mxu0  ;;  %v649_v29 = vpop.f32.mrb[3].mxu1 }
  0xe8   :  { %v1035_v27 = vadd.f32 %v1534_v23, %v1915_v7  ;;  %1256 = vst [vmem:[#allocation3] sm:$0xff] %v1192_v24  ;;  %1288 = vst [vmem:[#allocation3 + $0x100] sm:$0xff] %v1224_v25  ;;  %v1002_v30 = vadd.f32 %v1915_v7, %v489_v28  ;;  %v1034_v31 = vadd.f32 %v1915_v7, %v649_v29 }
  0xe9   :  { %vm1067_vm6 = vcmp.gt.f32.partialorder %v1003_v26, 0.0  ;;  %v1131_v32 = vmul.f32 0.1, %v1003_v26  ;;  %v1489_v38 = vpop.f32.mrb[4].mxu0  ;;  %v1537_v39 = vpop.f32.mrb[4].mxu1 }
  0xea   :  { %vm1099_vm7 = vcmp.gt.f32.partialorder %v1035_v27, 0.0  ;;  %v1163_v33 = vmul.f32 0.1, %v1035_v27  ;;  %vm1066_vm8 = vcmp.gt.f32.partialorder %v1002_v30, 0.0  ;;  %v1130_v34 = vmul.f32 0.1, %v1002_v30 }
  0xeb   :  { %vm1098_vm9 = vcmp.gt.f32.partialorder %v1034_v31, 0.0  ;;  %v1162_v35 = vmul.f32 0.1, %v1034_v31  ;;  %v1195_v36 = vsel %vm1067_vm6, %v1003_v26, %v1131_v32  ;;  %v1005_v42 = vadd.f32 %v1489_v38, %v1915_v7  ;;  %v499_v44 = vpop.f32.mrb[5].mxu0  ;;  %v659_v45 = vpop.f32.mrb[5].mxu1 }
  0xec   :  { %v1227_v37 = vsel %vm1099_vm7, %v1035_v27, %v1163_v33  ;;  %1259 = vst [vmem:[#allocation3 + $0x18] sm:$0xff] %v1195_v36  ;;  %v1194_v40 = vsel %vm1066_vm8, %v1002_v30, %v1130_v34  ;;  %v1037_v43 = vadd.f32 %v1537_v39, %v1915_v7  ;;  %v1004_v46 = vadd.f32 %v1915_v7, %v499_v44 }
  0xed   :  { %1291 = vst [vmem:[#allocation3 + $0x118] sm:$0xff] %v1227_v37  ;;  %v1226_v41 = vsel %vm1098_vm9, %v1034_v31, %v1162_v35  ;;  %1258 = vst [vmem:[#allocation3 + $0x10] sm:$0xff] %v1194_v40  ;;  %v1036_v47 = vadd.f32 %v1915_v7, %v659_v45  ;;  %v1492_v48 = vpop.f32.mrb[6].mxu0  ;;  %v1540_v49 = vpop.f32.mrb[6].mxu1  ;;  %vm1069_vm10 = vcmp.gt.f32.partialorder %v1005_v42, 0.0 }
  0xee   :  { %1290 = vst [vmem:[#allocation3 + $0x110] sm:$0xff] %v1226_v41  ;;  %v1133_v50 = vmul.f32 0.1, %v1005_v42  ;;  %vm1101_vm11 = vcmp.gt.f32.partialorder %v1037_v43, 0.0  ;;  %v1165_v51 = vmul.f32 0.1, %v1037_v43  ;;  %v1007_v56 = vadd.f32 %v1492_v48, %v1915_v7 }
  0xef   :  { %vm1068_vm12 = vcmp.gt.f32.partialorder %v1004_v46, 0.0  ;;  %v1132_v52 = vmul.f32 0.1, %v1004_v46  ;;  %vm1100_vm13 = vcmp.gt.f32.partialorder %v1036_v47, 0.0  ;;  %v1164_v53 = vmul.f32 0.1, %v1036_v47 }
  0xf0   :  { %v1197_v54 = vsel %vm1069_vm10, %v1005_v42, %v1133_v50  ;;  %v1229_v55 = vsel %vm1101_vm11, %v1037_v43, %v1165_v51  ;;  %v1039_v57 = vadd.f32 %v1540_v49, %v1915_v7  ;;  %v509_v58 = vpop.f32.mrb[7].mxu0  ;;  %v669_v59 = vpop.f32.mrb[7].mxu1  ;;  %vm1071_vm14 = vcmp.gt.f32.partialorder %v1007_v56, 0.0 }
  0xf1   :  { %1261 = vst [vmem:[#allocation3 + $0x28] sm:$0xff] %v1197_v54  ;;  %1293 = vst [vmem:[#allocation3 + $0x128] sm:$0xff] %v1229_v55  ;;  %v1196_v60 = vsel %vm1068_vm12, %v1004_v46, %v1132_v52  ;;  %v1228_v61 = vsel %vm1100_vm13, %v1036_v47, %v1164_v53  ;;  %v1006_v62 = vadd.f32 %v1915_v7, %v509_v58  ;;  %v1495_v0 = vpop.f32.mrb[8].mxu0  ;;  %v1543_v1 = vpop.f32.mrb[8].mxu1  ;;  %v1135_v2 = vmul.f32 0.1, %v1007_v56 }
  0xf2   :  { %v1038_v63 = vadd.f32 %v1915_v7, %v669_v59  ;;  %1260 = vst [vmem:[#allocation3 + $0x20] sm:$0xff] %v1196_v60  ;;  %1292 = vst [vmem:[#allocation3 + $0x120] sm:$0xff] %v1228_v61  ;;  %vm1103_vm15 = vcmp.gt.f32.partialorder %v1039_v57, 0.0  ;;  %v1167_v3 = vmul.f32 0.1, %v1039_v57  ;;  %v1009_v9 = vadd.f32 %v1495_v0, %v1915_v7  ;;  %v519_v11 = vpop.f32.mrb[9].mxu0 }
  0xf3   :  { %vm1070_vm0 = vcmp.gt.f32.partialorder %v1006_v62, 0.0  ;;  %v1134_v4 = vmul.f32 0.1, %v1006_v62  ;;  %v1199_v6 = vsel %vm1071_vm14, %v1007_v56, %v1135_v2  ;;  %v1041_v10 = vadd.f32 %v1543_v1, %v1915_v7  ;;  %v679_v12 = vpop.f32.mrb[9].mxu1 }
  0xf4   :  { %vm1102_vm1 = vcmp.gt.f32.partialorder %v1038_v63, 0.0  ;;  %v1166_v5 = vmul.f32 0.1, %v1038_v63  ;;  %v1231_v8 = vsel %vm1103_vm15, %v1039_v57, %v1167_v3  ;;  %1263 = vst [vmem:[#allocation3 + $0x38] sm:$0xff] %v1199_v6  ;;  %v1008_v15 = vadd.f32 %v1915_v7, %v519_v11 }
  0xf5   :  { %1295 = vst [vmem:[#allocation3 + $0x138] sm:$0xff] %v1231_v8  ;;  %v1198_v13 = vsel %vm1070_vm0, %v1006_v62, %v1134_v4  ;;  %v1040_v16 = vadd.f32 %v1915_v7, %v679_v12  ;;  %v1498_v17 = vpop.f32.mrb[10].mxu0  ;;  %v1546_v18 = vpop.f32.mrb[10].mxu1  ;;  %vm1073_vm2 = vcmp.gt.f32.partialorder %v1009_v9, 0.0  ;;  %v1137_v19 = vmul.f32 0.1, %v1009_v9 }
  0xf6   :  { %v1230_v14 = vsel %vm1102_vm1, %v1038_v63, %v1166_v5  ;;  %1262 = vst [vmem:[#allocation3 + $0x30] sm:$0xff] %v1198_v13  ;;  %vm1105_vm3 = vcmp.gt.f32.partialorder %v1041_v10, 0.0  ;;  %v1169_v20 = vmul.f32 0.1, %v1041_v10  ;;  %vm1072_vm4 = vcmp.gt.f32.partialorder %v1008_v15, 0.0  ;;  %v529_v27 = vpop.f32.mrb[11].mxu0 }
  0xf7   :  { %1294 = vst [vmem:[#allocation3 + $0x130] sm:$0xff] %v1230_v14  ;;  %v1136_v21 = vmul.f32 0.1, %v1008_v15  ;;  %vm1104_vm5 = vcmp.gt.f32.partialorder %v1040_v16, 0.0  ;;  %v1168_v22 = vmul.f32 0.1, %v1040_v16  ;;  %v1201_v23 = vsel %vm1073_vm2, %v1009_v9, %v1137_v19 }
  0xf8   :  { %v1233_v24 = vsel %vm1105_vm3, %v1041_v10, %v1169_v20  ;;  %v1011_v25 = vadd.f32 %v1498_v17, %v1915_v7  ;;  %v1043_v26 = vadd.f32 %v1546_v18, %v1915_v7  ;;  %v689_v28 = vpop.f32.mrb[11].mxu1  ;;  %1265 = vst [vmem:[#allocation3 + $0x48] sm:$0xff] %v1201_v23  ;;  %v1010_v31 = vadd.f32 %v1915_v7, %v529_v27 }
  0xf9   :  { %1297 = vst [vmem:[#allocation3 + $0x148] sm:$0xff] %v1233_v24  ;;  %v1200_v29 = vsel %vm1072_vm4, %v1008_v15, %v1136_v21  ;;  %v1232_v30 = vsel %vm1104_vm5, %v1040_v16, %v1168_v22  ;;  %v1042_v32 = vadd.f32 %v1915_v7, %v689_v28  ;;  %v1501_v33 = vpop.f32.mrb[12].mxu0  ;;  %v1549_v34 = vpop.f32.mrb[12].mxu1 }
  0xfa   :  { %1264 = vst [vmem:[#allocation3 + $0x40] sm:$0xff] %v1200_v29  ;;  %1296 = vst [vmem:[#allocation3 + $0x140] sm:$0xff] %v1232_v30  ;;  %vm1075_vm6 = vcmp.gt.f32.partialorder %v1011_v25, 0.0  ;;  %v1139_v35 = vmul.f32 0.1, %v1011_v25  ;;  %vm1107_vm7 = vcmp.gt.f32.partialorder %v1043_v26, 0.0  ;;  %v1013_v41 = vadd.f32 %v1501_v33, %v1915_v7 }
  0xfb   :  { %v1171_v36 = vmul.f32 0.1, %v1043_v26  ;;  %vm1074_vm8 = vcmp.gt.f32.partialorder %v1010_v31, 0.0  ;;  %v1138_v37 = vmul.f32 0.1, %v1010_v31  ;;  %vm1106_vm9 = vcmp.gt.f32.partialorder %v1042_v32, 0.0 }
  0xfc   :  { %v1170_v38 = vmul.f32 0.1, %v1042_v32  ;;  %v1203_v39 = vsel %vm1075_vm6, %v1011_v25, %v1139_v35  ;;  %v1045_v42 = vadd.f32 %v1549_v34, %v1915_v7  ;;  %v539_v43 = vpop.f32.mrb[13].mxu0  ;;  %v699_v44 = vpop.f32.mrb[13].mxu1  ;;  %vm1077_vm10 = vcmp.gt.f32.partialorder %v1013_v41, 0.0 }
  0xfd   :  { %v1235_v40 = vsel %vm1107_vm7, %v1043_v26, %v1171_v36  ;;  %1267 = vst [vmem:[#allocation3 + $0x58] sm:$0xff] %v1203_v39  ;;  %v1202_v45 = vsel %vm1074_vm8, %v1010_v31, %v1138_v37  ;;  %v1012_v47 = vadd.f32 %v1915_v7, %v539_v43  ;;  %v1044_v48 = vadd.f32 %v1915_v7, %v699_v44  ;;  %v1504_v49 = vpop.f32.mrb[14].mxu0  ;;  %v1552_v50 = vpop.f32.mrb[14].mxu1 }
  0xfe   :  { %1299 = vst [vmem:[#allocation3 + $0x158] sm:$0xff] %v1235_v40  ;;  %v1234_v46 = vsel %vm1106_vm9, %v1042_v32, %v1170_v38  ;;  %1266 = vst [vmem:[#allocation3 + $0x50] sm:$0xff] %v1202_v45  ;;  %v1141_v51 = vmul.f32 0.1, %v1013_v41  ;;  %vm1109_vm11 = vcmp.gt.f32.partialorder %v1045_v42, 0.0  ;;  %v1015_v57 = vadd.f32 %v1504_v49, %v1915_v7  ;;  %v549_v59 = vpop.f32.mrb[15].mxu0 }
  0xff   :  { %1298 = vst [vmem:[#allocation3 + $0x150] sm:$0xff] %v1234_v46  ;;  %v1173_v52 = vmul.f32 0.1, %v1045_v42  ;;  %vm1076_vm12 = vcmp.gt.f32.partialorder %v1012_v47, 0.0  ;;  %v1140_v53 = vmul.f32 0.1, %v1012_v47  ;;  %v1047_v58 = vadd.f32 %v1552_v50, %v1915_v7 }
 0x100   :  { %vm1108_vm13 = vcmp.gt.f32.partialorder %v1044_v48, 0.0  ;;  %v1172_v54 = vmul.f32 0.1, %v1044_v48  ;;  %v1205_v55 = vsel %vm1077_vm10, %v1013_v41, %v1141_v51  ;;  %v709_v60 = vpop.f32.mrb[15].mxu1  ;;  %v1014_v63 = vadd.f32 %v1915_v7, %v549_v59 }
 0x101   :  { %v1237_v56 = vsel %vm1109_vm11, %v1045_v42, %v1173_v52  ;;  %1269 = vst [vmem:[#allocation3 + $0x68] sm:$0xff] %v1205_v55  ;;  %v1204_v61 = vsel %vm1076_vm12, %v1012_v47, %v1140_v53  ;;  %v1046_v0 = vadd.f32 %v1915_v7, %v709_v60  ;;  %v1507_v1 = vpop.f32.mrb[16].mxu0  ;;  %v1555_v2 = vpop.f32.mrb[16].mxu1  ;;  %vm1079_vm14 = vcmp.gt.f32.partialorder %v1015_v57, 0.0 }
 0x102   :  { %1301 = vst [vmem:[#allocation3 + $0x168] sm:$0xff] %v1237_v56  ;;  %v1236_v62 = vsel %vm1108_vm13, %v1044_v48, %v1172_v54  ;;  %1268 = vst [vmem:[#allocation3 + $0x60] sm:$0xff] %v1204_v61  ;;  %v1143_v3 = vmul.f32 0.1, %v1015_v57  ;;  %vm1111_vm15 = vcmp.gt.f32.partialorder %v1047_v58, 0.0  ;;  %vm1078_vm0 = vcmp.gt.f32.partialorder %v1014_v63, 0.0 }
 0x103   :  { %1300 = vst [vmem:[#allocation3 + $0x160] sm:$0xff] %v1236_v62  ;;  %v1175_v4 = vmul.f32 0.1, %v1047_v58  ;;  %v1142_v5 = vmul.f32 0.1, %v1014_v63  ;;  %vm1110_vm1 = vcmp.gt.f32.partialorder %v1046_v0, 0.0  ;;  %v1017_v10 = vadd.f32 %v1507_v1, %v1915_v7 }
 0x104   :  { %v1174_v6 = vmul.f32 0.1, %v1046_v0  ;;  %v1207_v8 = vsel %vm1079_vm14, %v1015_v57, %v1143_v3  ;;  %v1049_v11 = vadd.f32 %v1555_v2, %v1915_v7  ;;  %v559_v12 = vpop.f32.mrb[17].mxu0  ;;  %v719_v13 = vpop.f32.mrb[17].mxu1 }
 0x105   :  { %v1239_v9 = vsel %vm1111_vm15, %v1047_v58, %v1175_v4  ;;  %1271 = vst [vmem:[#allocation3 + $0x78] sm:$0xff] %v1207_v8  ;;  %v1206_v14 = vsel %vm1078_vm0, %v1014_v63, %v1142_v5  ;;  %v1016_v16 = vadd.f32 %v1915_v7, %v559_v12  ;;  %v1048_v17 = vadd.f32 %v1915_v7, %v719_v13  ;;  %v1510_v18 = vpop.f32.mrb[18].mxu0  ;;  %v1558_v19 = vpop.f32.mrb[18].mxu1 }
 0x106   :  { %1303 = vst [vmem:[#allocation3 + $0x178] sm:$0xff] %v1239_v9  ;;  %v1238_v15 = vsel %vm1110_vm1, %v1046_v0, %v1174_v6  ;;  %1270 = vst [vmem:[#allocation3 + $0x70] sm:$0xff] %v1206_v14  ;;  %vm1081_vm2 = vcmp.gt.f32.partialorder %v1017_v10, 0.0  ;;  %v1145_v20 = vmul.f32 0.1, %v1017_v10  ;;  %vm1113_vm3 = vcmp.gt.f32.partialorder %v1049_v11, 0.0 }
 0x107   :  { %1302 = vst [vmem:[#allocation3 + $0x170] sm:$0xff] %v1238_v15  ;;  %v1177_v21 = vmul.f32 0.1, %v1049_v11  ;;  %vm1080_vm4 = vcmp.gt.f32.partialorder %v1016_v16, 0.0  ;;  %v1144_v22 = vmul.f32 0.1, %v1016_v16  ;;  %v1019_v26 = vadd.f32 %v1510_v18, %v1915_v7 }
 0x108   :  { %vm1112_vm5 = vcmp.gt.f32.partialorder %v1048_v17, 0.0  ;;  %v1176_v23 = vmul.f32 0.1, %v1048_v17  ;;  %v1209_v24 = vsel %vm1081_vm2, %v1017_v10, %v1145_v20  ;;  %v1051_v27 = vadd.f32 %v1558_v19, %v1915_v7  ;;  %v569_v28 = vpop.f32.mrb[19].mxu0  ;;  %v729_v29 = vpop.f32.mrb[19].mxu1 }
 0x109   :  { %v1241_v25 = vsel %vm1113_vm3, %v1049_v11, %v1177_v21  ;;  %1273 = vst [vmem:[#allocation3 + $0x88] sm:$0xff] %v1209_v24  ;;  %v1208_v30 = vsel %vm1080_vm4, %v1016_v16, %v1144_v22  ;;  %v1018_v32 = vadd.f32 %v1915_v7, %v569_v28  ;;  %v1050_v33 = vadd.f32 %v1915_v7, %v729_v29  ;;  %v1513_v34 = vpop.f32.mrb[20].mxu0  ;;  %v1561_v35 = vpop.f32.mrb[20].mxu1 }
 0x10a   :  { %1305 = vst [vmem:[#allocation3 + $0x188] sm:$0xff] %v1241_v25  ;;  %v1240_v31 = vsel %vm1112_vm5, %v1048_v17, %v1176_v23  ;;  %1272 = vst [vmem:[#allocation3 + $0x80] sm:$0xff] %v1208_v30  ;;  %vm1083_vm6 = vcmp.gt.f32.partialorder %v1019_v26, 0.0  ;;  %v1147_v36 = vmul.f32 0.1, %v1019_v26  ;;  %vm1115_vm7 = vcmp.gt.f32.partialorder %v1051_v27, 0.0 }
 0x10b   :  { %1304 = vst [vmem:[#allocation3 + $0x180] sm:$0xff] %v1240_v31  ;;  %v1179_v37 = vmul.f32 0.1, %v1051_v27  ;;  %vm1082_vm8 = vcmp.gt.f32.partialorder %v1018_v32, 0.0  ;;  %v1146_v38 = vmul.f32 0.1, %v1018_v32  ;;  %v1021_v42 = vadd.f32 %v1513_v34, %v1915_v7 }
 0x10c   :  { %vm1114_vm9 = vcmp.gt.f32.partialorder %v1050_v33, 0.0  ;;  %v1178_v39 = vmul.f32 0.1, %v1050_v33  ;;  %v1211_v40 = vsel %vm1083_vm6, %v1019_v26, %v1147_v36  ;;  %v1053_v43 = vadd.f32 %v1561_v35, %v1915_v7  ;;  %v579_v44 = vpop.f32.mrb[21].mxu0  ;;  %v739_v45 = vpop.f32.mrb[21].mxu1 }
 0x10d   :  { %v1243_v41 = vsel %vm1115_vm7, %v1051_v27, %v1179_v37  ;;  %1275 = vst [vmem:[#allocation3 + $0x98] sm:$0xff] %v1211_v40  ;;  %v1210_v46 = vsel %vm1082_vm8, %v1018_v32, %v1146_v38  ;;  %v1020_v48 = vadd.f32 %v1915_v7, %v579_v44  ;;  %v1052_v49 = vadd.f32 %v1915_v7, %v739_v45  ;;  %v1516_v50 = vpop.f32.mrb[22].mxu0  ;;  %v1564_v51 = vpop.f32.mrb[22].mxu1 }
 0x10e   :  { %1307 = vst [vmem:[#allocation3 + $0x198] sm:$0xff] %v1243_v41  ;;  %v1242_v47 = vsel %vm1114_vm9, %v1050_v33, %v1178_v39  ;;  %1274 = vst [vmem:[#allocation3 + $0x90] sm:$0xff] %v1210_v46  ;;  %vm1085_vm10 = vcmp.gt.f32.partialorder %v1021_v42, 0.0  ;;  %v1149_v52 = vmul.f32 0.1, %v1021_v42  ;;  %vm1117_vm11 = vcmp.gt.f32.partialorder %v1053_v43, 0.0 }
 0x10f   :  { %1306 = vst [vmem:[#allocation3 + $0x190] sm:$0xff] %v1242_v47  ;;  %v1181_v53 = vmul.f32 0.1, %v1053_v43  ;;  %vm1084_vm12 = vcmp.gt.f32.partialorder %v1020_v48, 0.0  ;;  %v1148_v54 = vmul.f32 0.1, %v1020_v48  ;;  %v1023_v58 = vadd.f32 %v1516_v50, %v1915_v7 }
 0x110   :  { %vm1116_vm13 = vcmp.gt.f32.partialorder %v1052_v49, 0.0  ;;  %v1180_v55 = vmul.f32 0.1, %v1052_v49  ;;  %v1213_v56 = vsel %vm1085_vm10, %v1021_v42, %v1149_v52  ;;  %v1055_v59 = vadd.f32 %v1564_v51, %v1915_v7  ;;  %v589_v60 = vpop.f32.mrb[23].mxu0  ;;  %v749_v61 = vpop.f32.mrb[23].mxu1 }
 0x111   :  { %v1245_v57 = vsel %vm1117_vm11, %v1053_v43, %v1181_v53  ;;  %1277 = vst [vmem:[#allocation3 + $0xa8] sm:$0xff] %v1213_v56  ;;  %v1212_v62 = vsel %vm1084_vm12, %v1020_v48, %v1148_v54  ;;  %v1022_v0 = vadd.f32 %v1915_v7, %v589_v60  ;;  %v1054_v1 = vadd.f32 %v1915_v7, %v749_v61  ;;  %v1519_v2 = vpop.f32.mrb[24].mxu0  ;;  %v1567_v3 = vpop.f32.mrb[24].mxu1 }
 0x112   :  { %1309 = vst [vmem:[#allocation3 + $0x1a8] sm:$0xff] %v1245_v57  ;;  %v1244_v63 = vsel %vm1116_vm13, %v1052_v49, %v1180_v55  ;;  %1276 = vst [vmem:[#allocation3 + $0xa0] sm:$0xff] %v1212_v62  ;;  %vm1087_vm14 = vcmp.gt.f32.partialorder %v1023_v58, 0.0  ;;  %v1151_v4 = vmul.f32 0.1, %v1023_v58  ;;  %vm1119_vm15 = vcmp.gt.f32.partialorder %v1055_v59, 0.0 }
 0x113   :  { %1308 = vst [vmem:[#allocation3 + $0x1a0] sm:$0xff] %v1244_v63  ;;  %v1183_v5 = vmul.f32 0.1, %v1055_v59  ;;  %vm1086_vm0 = vcmp.gt.f32.partialorder %v1022_v0, 0.0  ;;  %v1150_v6 = vmul.f32 0.1, %v1022_v0  ;;  %v1025_v11 = vadd.f32 %v1519_v2, %v1915_v7 }
 0x114   :  { %vm1118_vm1 = vcmp.gt.f32.partialorder %v1054_v1, 0.0  ;;  %v1182_v8 = vmul.f32 0.1, %v1054_v1  ;;  %v1215_v9 = vsel %vm1087_vm14, %v1023_v58, %v1151_v4  ;;  %v1057_v12 = vadd.f32 %v1567_v3, %v1915_v7  ;;  %v599_v13 = vpop.f32.mrb[25].mxu0  ;;  %v759_v14 = vpop.f32.mrb[25].mxu1 }
 0x115   :  { %v1247_v10 = vsel %vm1119_vm15, %v1055_v59, %v1183_v5  ;;  %1279 = vst [vmem:[#allocation3 + $0xb8] sm:$0xff] %v1215_v9  ;;  %v1214_v15 = vsel %vm1086_vm0, %v1022_v0, %v1150_v6  ;;  %v1024_v17 = vadd.f32 %v1915_v7, %v599_v13  ;;  %v1056_v18 = vadd.f32 %v1915_v7, %v759_v14  ;;  %v1522_v19 = vpop.f32.mrb[26].mxu0  ;;  %v1570_v20 = vpop.f32.mrb[26].mxu1 }
 0x116   :  { %1311 = vst [vmem:[#allocation3 + $0x1b8] sm:$0xff] %v1247_v10  ;;  %v1246_v16 = vsel %vm1118_vm1, %v1054_v1, %v1182_v8  ;;  %1278 = vst [vmem:[#allocation3 + $0xb0] sm:$0xff] %v1214_v15  ;;  %vm1089_vm2 = vcmp.gt.f32.partialorder %v1025_v11, 0.0  ;;  %v1153_v21 = vmul.f32 0.1, %v1025_v11  ;;  %vm1121_vm3 = vcmp.gt.f32.partialorder %v1057_v12, 0.0 }
 0x117   :  { %1310 = vst [vmem:[#allocation3 + $0x1b0] sm:$0xff] %v1246_v16  ;;  %v1185_v22 = vmul.f32 0.1, %v1057_v12  ;;  %vm1088_vm4 = vcmp.gt.f32.partialorder %v1024_v17, 0.0  ;;  %v1152_v23 = vmul.f32 0.1, %v1024_v17  ;;  %v1027_v27 = vadd.f32 %v1522_v19, %v1915_v7 }
 0x118   :  { %vm1120_vm5 = vcmp.gt.f32.partialorder %v1056_v18, 0.0  ;;  %v1184_v24 = vmul.f32 0.1, %v1056_v18  ;;  %v1217_v25 = vsel %vm1089_vm2, %v1025_v11, %v1153_v21  ;;  %v1059_v28 = vadd.f32 %v1570_v20, %v1915_v7  ;;  %v609_v29 = vpop.f32.mrb[27].mxu0  ;;  %v769_v30 = vpop.f32.mrb[27].mxu1 }
 0x119   :  { %v1249_v26 = vsel %vm1121_vm3, %v1057_v12, %v1185_v22  ;;  %1281 = vst [vmem:[#allocation3 + $0xc8] sm:$0xff] %v1217_v25  ;;  %v1216_v31 = vsel %vm1088_vm4, %v1024_v17, %v1152_v23  ;;  %v1026_v33 = vadd.f32 %v1915_v7, %v609_v29  ;;  %v1058_v34 = vadd.f32 %v1915_v7, %v769_v30  ;;  %v1525_v35 = vpop.f32.mrb[28].mxu0  ;;  %v1573_v36 = vpop.f32.mrb[28].mxu1 }
 0x11a   :  { %1313 = vst [vmem:[#allocation3 + $0x1c8] sm:$0xff] %v1249_v26  ;;  %v1248_v32 = vsel %vm1120_vm5, %v1056_v18, %v1184_v24  ;;  %1280 = vst [vmem:[#allocation3 + $0xc0] sm:$0xff] %v1216_v31  ;;  %vm1091_vm6 = vcmp.gt.f32.partialorder %v1027_v27, 0.0  ;;  %v1155_v37 = vmul.f32 0.1, %v1027_v27  ;;  %vm1123_vm7 = vcmp.gt.f32.partialorder %v1059_v28, 0.0 }
 0x11b   :  { %1312 = vst [vmem:[#allocation3 + $0x1c0] sm:$0xff] %v1248_v32  ;;  %v1187_v38 = vmul.f32 0.1, %v1059_v28  ;;  %vm1090_vm8 = vcmp.gt.f32.partialorder %v1026_v33, 0.0  ;;  %v1154_v39 = vmul.f32 0.1, %v1026_v33  ;;  %v1029_v43 = vadd.f32 %v1525_v35, %v1915_v7 }
 0x11c   :  { %vm1122_vm9 = vcmp.gt.f32.partialorder %v1058_v34, 0.0  ;;  %v1186_v40 = vmul.f32 0.1, %v1058_v34  ;;  %v1219_v41 = vsel %vm1091_vm6, %v1027_v27, %v1155_v37  ;;  %v1061_v44 = vadd.f32 %v1573_v36, %v1915_v7  ;;  %v619_v45 = vpop.f32.mrb[29].mxu0  ;;  %v779_v46 = vpop.f32.mrb[29].mxu1 }
 0x11d   :  { %v1251_v42 = vsel %vm1123_vm7, %v1059_v28, %v1187_v38  ;;  %1283 = vst [vmem:[#allocation3 + $0xd8] sm:$0xff] %v1219_v41  ;;  %v1218_v47 = vsel %vm1090_vm8, %v1026_v33, %v1154_v39  ;;  %v1028_v49 = vadd.f32 %v1915_v7, %v619_v45  ;;  %v1060_v50 = vadd.f32 %v1915_v7, %v779_v46  ;;  %v1528_v51 = vpop.f32.mrb[30].mxu0  ;;  %v1576_v52 = vpop.f32.mrb[30].mxu1 }
 0x11e   :  { %1315 = vst [vmem:[#allocation3 + $0x1d8] sm:$0xff] %v1251_v42  ;;  %v1250_v48 = vsel %vm1122_vm9, %v1058_v34, %v1186_v40  ;;  %1282 = vst [vmem:[#allocation3 + $0xd0] sm:$0xff] %v1218_v47  ;;  %vm1093_vm10 = vcmp.gt.f32.partialorder %v1029_v43, 0.0  ;;  %v1157_v53 = vmul.f32 0.1, %v1029_v43  ;;  %vm1125_vm11 = vcmp.gt.f32.partialorder %v1061_v44, 0.0 }
 0x11f   :  { %1314 = vst [vmem:[#allocation3 + $0x1d0] sm:$0xff] %v1250_v48  ;;  %v1189_v54 = vmul.f32 0.1, %v1061_v44  ;;  %vm1092_vm12 = vcmp.gt.f32.partialorder %v1028_v49, 0.0  ;;  %v1156_v55 = vmul.f32 0.1, %v1028_v49  ;;  %v1031_v59 = vadd.f32 %v1528_v51, %v1915_v7 }
 0x120   :  { %vm1124_vm13 = vcmp.gt.f32.partialorder %v1060_v50, 0.0  ;;  %v1188_v56 = vmul.f32 0.1, %v1060_v50  ;;  %v1221_v57 = vsel %vm1093_vm10, %v1029_v43, %v1157_v53  ;;  %v1063_v60 = vadd.f32 %v1576_v52, %v1915_v7  ;;  %v629_v61 = vpop.f32.mrb[31].mxu0  ;;  %v789_v62 = vpop.f32.mrb[31].mxu1 }
 0x121   :  { %v1253_v58 = vsel %vm1125_vm11, %v1061_v44, %v1189_v54  ;;  %1285 = vst [vmem:[#allocation3 + $0xe8] sm:$0xff] %v1221_v57  ;;  %v1220_v63 = vsel %vm1092_vm12, %v1028_v49, %v1156_v55  ;;  %v1030_v1 = vadd.f32 %v1915_v7, %v629_v61  ;;  %v1062_v2 = vadd.f32 %v1915_v7, %v789_v62 }
 0x122   :  { %1317 = vst [vmem:[#allocation3 + $0x1e8] sm:$0xff] %v1253_v58  ;;  %v1252_v0 = vsel %vm1124_vm13, %v1060_v50, %v1188_v56  ;;  %1284 = vst [vmem:[#allocation3 + $0xe0] sm:$0xff] %v1220_v63  ;;  %vm1095_vm14 = vcmp.gt.f32.partialorder %v1031_v59, 0.0  ;;  %v1159_v3 = vmul.f32 0.1, %v1031_v59  ;;  %vm1127_vm15 = vcmp.gt.f32.partialorder %v1063_v60, 0.0 }
 0x123   :  { %1316 = vst [vmem:[#allocation3 + $0x1e0] sm:$0xff] %v1252_v0  ;;  %v1191_v4 = vmul.f32 0.1, %v1063_v60  ;;  %vm1094_vm0 = vcmp.gt.f32.partialorder %v1030_v1, 0.0  ;;  %v1158_v5 = vmul.f32 0.1, %v1030_v1 }
 0x124   :  { %vm1126_vm1 = vcmp.gt.f32.partialorder %v1062_v2, 0.0  ;;  %v1190_v6 = vmul.f32 0.1, %v1062_v2  ;;  %v1223_v8 = vsel %vm1095_vm14, %v1031_v59, %v1159_v3 }
 0x125   :  { %v1255_v9 = vsel %vm1127_vm15, %v1063_v60, %v1191_v4  ;;  %1287 = vst [vmem:[#allocation3 + $0xf8] sm:$0xff] %v1223_v8  ;;  %v1222_v10 = vsel %vm1094_vm0, %v1030_v1, %v1158_v5 }
 0x126   :  { %1319 = vst [vmem:[#allocation3 + $0x1f8] sm:$0xff] %v1255_v9  ;;  %v1254_v11 = vsel %vm1126_vm1, %v1062_v2, %v1190_v6  ;;  %1286 = vst [vmem:[#allocation3 + $0xf0] sm:$0xff] %v1222_v10 }
 0x127   :  { %1318 = vst [vmem:[#allocation3 + $0x1f0] sm:$0xff] %v1254_v11 }
 0x128   :  { %1605 = shalt.err (!%p1602_p4)
}
 0x129   :  { %s1606_s15 = scalar_lea.hbm %s1996_s3, 8192 }
 0x12a   :  { %p1607_p5 = scmp.ne.s32.totalorder %s1996_s3, %s1606_s15  ;;  %p1610_p6 = scmp.lt.u32.totalorder %s1606_s15, %s1996_s3 }
 0x12c   :  { %p1612_p7 = pnand %p1610_p6, %p1607_p5 }
 0x12e   :  { %1615 = shalt.err (!%p1612_p7)
}
 0x12f   :  { %s1619_s20 = smov 128   ;;  %s1620_s21 = smov 8  }
 0x130   :  { %1331 = dma.vmem_to_hbm [thread:$0]  %s1326_s2, 8192, %s1996_s3, [#allocation4], %s1619_s20, %s1619_s20, %s1620_s21  }
 0x131   :  { %1616 = dma.done.wait [#allocation4], 8192  }
 0x132   :  { %1617 = vsyncadd [#allocation4], 4294959104 }
 0x133   :  { %1335 = vsyncpa [#allocation4], 1 }

</bundles_post_ra>
